<compile_context>
chip_gen: v6e
topology: v6e:2x2x1
jax: 0.10.0
libtpu: 0.0.40
codegen_flags: <defaults>
</compile_context>

<pallas_src>
import jax
import jax.numpy as jnp
from jax.experimental import pallas as pl
from jax.experimental.pallas import tpu as pltpu


# ---- packed-parameter layout inside the (32, 128) f32 buffer -----------------
#   rows 0:4  , cols 0:24  -> W1      (4, 24)   trunk Linear(4, 24) weight (in, out)
#   row  4    , cols 0:24  -> b1      (1, 24)
#   row  5    , cols 0:3   -> b_heads (1, 3)    [b_actor(2) | b_critic(1)]
#   rows 8:32 , cols 0:3   -> W_heads (24, 3)   [W_actor(24,2) | W_critic(24,1)]
_PARAM_ROWS = 32
_PARAM_COLS = 128


def _actor_critic_kernel(x_ref, p_ref, out_ref):
    x = x_ref[...]                                  # (TILE_B, 4) f32
    w1 = p_ref[0:4, 0:24]                           # (4, 24)
    b1 = p_ref[4:5, 0:24]                           # (1, 24)
    bh = p_ref[5:6, 0:3]                            # (1, 3)
    wh = p_ref[8:32, 0:3]                           # (24, 3)

    # Shared trunk: Linear(4, 24) + ReLU
    h = jnp.dot(x, w1, preferred_element_type=jnp.float32) + b1
    h = jnp.maximum(h, 0.0)                         # (TILE_B, 24)

    # Fused heads: one matmul produces [logit(2) | value(1)]
    out = jnp.dot(h, wh, preferred_element_type=jnp.float32) + bh
    out_ref[...] = out.astype(out_ref.dtype)        # (TILE_B, 3)


def _round_up(n, m):
    return ((n + m - 1) // m) * m


def pack_params(params):
    """Pack (transposed, torch-equivalent) weights into one (32, 128) buffer."""
    w_heads = jnp.concatenate([params["w2"], params["w3"]], axis=1)   # (24, 3)
    b_heads = jnp.concatenate([params["b2"], params["b3"]], axis=1)   # (1, 3)
    p = jnp.zeros((_PARAM_ROWS, _PARAM_COLS), jnp.float32)
    p = p.at[0:4, 0:24].set(params["w1"])
    p = p.at[4:5, 0:24].set(params["b1"])
    p = p.at[5:6, 0:3].set(b_heads)
    p = p.at[8:32, 0:3].set(w_heads)
    return p


def actor_critic_forward(x, packed_params):
    """x: (B, 4) float32. packed_params: (32, 128) f32 from pack_params()."""
    B = x.shape[0]

    # Sublane-align the batch, then pick a tile size and pad to a whole number
    # of tiles so every block is full (no masked sublane traffic).
    b8 = _round_up(max(B, 1), 8)
    tile_b = min(b8, 512)
    b_pad = _round_up(b8, tile_b)
    if b_pad != B:
        x = jnp.pad(x, ((0, b_pad - B), (0, 0)))

    grid = (b_pad // tile_b,)
    flops = 2 * b_pad * (4 * 24 + 24 * 3)
    bytes_accessed = 4 * (b_pad * 4 + _PARAM_ROWS * _PARAM_COLS + b_pad * 3)

    out = pl.pallas_call(
        _actor_critic_kernel,
        out_shape=jax.ShapeDtypeStruct((b_pad, 3), jnp.float32),
        grid=grid,
        in_specs=[
            pl.BlockSpec((tile_b, 4), lambda i: (i, 0)),           # x tile
            pl.BlockSpec((_PARAM_ROWS, _PARAM_COLS),                # params,
                         lambda i: (0, 0)),                         # VMEM-resident
        ],
        out_specs=pl.BlockSpec((tile_b, 3), lambda i: (i, 0)),
        compiler_params=pltpu.CompilerParams(
            dimension_semantics=("parallel",)),
        cost_estimate=pl.CostEstimate(
            flops=flops, transcendentals=0, bytes_accessed=bytes_accessed),
    )(x, packed_params)

    logit = out[:B, 0:2]
    value = out[:B, 2:3]
    return logit, value


def init_params(key):
    """Deterministic init mimicking torch.nn.Linear default U(-k, k), k=1/sqrt(fan_in)."""
    k1, k2, k3, k4, k5, k6 = jax.random.split(key, 6)

    def lin(kw, kb, fan_in, fan_out):
        bound = 1.0 / jnp.sqrt(fan_in)
        w = jax.random.uniform(kw, (fan_in, fan_out), jnp.float32, -bound, bound)
        b = jax.random.uniform(kb, (1, fan_out), jnp.float32, -bound, bound)
        return w, b

    w1, b1 = lin(k1, k2, 4, 24)    # ActorCritic: Linear(4, 24)
    w2, b2 = lin(k3, k4, 24, 2)    # Actor:       Linear(24, 2)
    w3, b3 = lin(k5, k6, 24, 1)    # Critic:      Linear(24, 1)
    return {"w1": w1, "b1": b1, "w2": w2, "b2": b2, "w3": w3, "b3": b3}


def _reference(x, params):
    h = jnp.maximum(x @ params["w1"] + params["b1"], 0.0)
    return h @ params["w2"] + params["b2"], h @ params["w3"] + params["b3"]


if __name__ == "__main__":
    key = jax.random.PRNGKey(0)
    pkey, xkey, xkey2 = jax.random.split(key, 3)
    params = init_params(pkey)
    packed = pack_params(params)

    # Sublane-aligned batch.
    B = 8
    x = jax.random.normal(xkey, (B, 4), dtype=jnp.float32)
    logit, value = actor_critic_forward(x, packed)
    jax.block_until_ready((logit, value))

    logit_ref, value_ref = _reference(x, params)
    assert logit.shape == (B, 2) and value.shape == (B, 1)
    assert jnp.allclose(logit, logit_ref, atol=1e-5)
    assert jnp.allclose(value, value_ref, atol=1e-5)

    # Non-aligned batch exercises the wrapper-side padding path.
    B2 = 5
    x2 = jax.random.normal(xkey2, (B2, 4), dtype=jnp.float32)
    logit2, value2 = actor_critic_forward(x2, packed)
    jax.block_until_ready((logit2, value2))
    logit2_ref, value2_ref = _reference(x2, params)
    assert logit2.shape == (B2, 2) and value2.shape == (B2, 1)
    assert jnp.allclose(logit2, logit2_ref, atol=1e-5)
    assert jnp.allclose(value2, value2_ref, atol=1e-5)

    print("KERNEL_OK")
</pallas_src>

<mosaic_0001>
module attributes {stable_mosaic.version = 11 : i64} {
  func.func @_actor_critic_kernel(%arg0: i32, %arg1: memref<8x4xf32, #tpu.memory_space<vmem>>, %arg2: memref<32x128xf32, #tpu.memory_space<vmem>>, %arg3: memref<8x3xf32, #tpu.memory_space<vmem>>) attributes {dimension_semantics = [#tpu.dimension_semantics<parallel>], iteration_bounds = array<i64: 1>, scalar_prefetch = 0 : i64, scratch_operands = 0 : i64, tpu.core_type = #tpu.core_type<tc>, window_params = [{transform_indices = @transform_0, window_bounds = array<i64: 8, 4>}, {pipeline_mode = #tpu.pipeline_mode<synchronous>, transform_indices = @transform_1, window_bounds = array<i64: 32, 128>}, {transform_indices = @transform_2, window_bounds = array<i64: 8, 3>}]} {
    %c0 = arith.constant 0 : index
    %c0_0 = arith.constant 0 : index
    %0 = vector.load %arg1[%c0, %c0_0] : memref<8x4xf32, #tpu.memory_space<vmem>>, vector<8x4xf32>
    %c0_1 = arith.constant 0 : index
    %c0_2 = arith.constant 0 : index
    %1 = vector.load %arg2[%c0_1, %c0_2] : memref<32x128xf32, #tpu.memory_space<vmem>>, vector<4x24xf32>
    %c4 = arith.constant 4 : index
    %c0_3 = arith.constant 0 : index
    %2 = vector.load %arg2[%c4, %c0_3] : memref<32x128xf32, #tpu.memory_space<vmem>>, vector<1x24xf32>
    %c5 = arith.constant 5 : index
    %c0_4 = arith.constant 0 : index
    %3 = vector.load %arg2[%c5, %c0_4] : memref<32x128xf32, #tpu.memory_space<vmem>>, vector<1x3xf32>
    %c8 = arith.constant 8 : index
    %c0_5 = arith.constant 0 : index
    %4 = vector.load %arg2[%c8, %c0_5] : memref<32x128xf32, #tpu.memory_space<vmem>>, vector<24x3xf32>
    %cst = arith.constant dense<0.000000e+00> : vector<8x24xf32>
    %5 = tpu.matmul %0, %1, %cst {dimension_numbers = #tpu.dot_dimension_numbers<[1], [0], [0], [1], [0, 0, 1, 1], [], []>} : vector<8x4xf32>, vector<4x24xf32>, vector<8x24xf32> -> vector<8x24xf32>
    %6 = vector.broadcast %2 : vector<1x24xf32> to vector<8x24xf32>
    %7 = arith.addf %5, %6 : vector<8x24xf32>
    %cst_6 = arith.constant 0.000000e+00 : f32
    %8 = vector.broadcast %cst_6 : f32 to vector<8x24xf32>
    %9 = arith.maximumf %7, %8 : vector<8x24xf32>
    %cst_7 = arith.constant dense<0.000000e+00> : vector<8x3xf32>
    %10 = tpu.matmul %9, %4, %cst_7 {dimension_numbers = #tpu.dot_dimension_numbers<[1], [0], [0], [1], [0, 0, 1, 1], [], []>} : vector<8x24xf32>, vector<24x3xf32>, vector<8x3xf32> -> vector<8x3xf32>
    %11 = vector.broadcast %3 : vector<1x3xf32> to vector<8x3xf32>
    %12 = arith.addf %10, %11 : vector<8x3xf32>
    %c0_8 = arith.constant 0 : index
    %c0_9 = arith.constant 0 : index
    %13 = vector.load %arg3[%c0_8, %c0_9] : memref<8x3xf32, #tpu.memory_space<vmem>>, vector<8x3xf32>
    tpu.vector_store %arg3[%c0_8, %c0_9], %12 {strides = array<i32>} : memref<8x3xf32, #tpu.memory_space<vmem>>, vector<8x3xf32>,
    return
  }
  func.func @transform_0(%arg0: i32) -> (i32, i32) {
    %c0_i32 = arith.constant 0 : i32
    %c0_i32_0 = arith.constant 0 : i32
    return %arg0, %c0_i32 : i32, i32
  }
  func.func @transform_1(%arg0: i32) -> (i32, i32) {
    %c0_i32 = arith.constant 0 : i32
    %c0_i32_0 = arith.constant 0 : i32
    %c0_i32_1 = arith.constant 0 : i32
    return %c0_i32, %c0_i32_0 : i32, i32
  }
  func.func @transform_2(%arg0: i32) -> (i32, i32) {
    %c0_i32 = arith.constant 0 : i32
    %c0_i32_0 = arith.constant 0 : i32
    return %arg0, %c0_i32 : i32, i32
  }
}

</mosaic_0001>

<bundles_post_ra>
// kernel: tpu_custom_call.1
= control target key start
LH: loop header
LB: loop body
LE: loop exit
PB: predicated region body
PF: predicated region fallthrough
CT: control target
= control target key end

     0   :  { %7 = vsyncpa [#allocation3], 0  ;;  %s252_s9 = smov [#allocation2]   ;;  %s281_s0 = inlined_call_operand.vmem [shape: f32[8,4], index: 0, kind: input, shape index: {}]   ;;  %s282_s1 = inlined_call_operand.hbm [shape: f32[32,128], index: 1, kind: input, shape index: {}]   ;;  %s283_s2 = inlined_call_operand.vmem [shape: f32[8,3], index: 2, kind: output, shape index: {}]  }
   0x1   :  { %s15_s10 = sshll.u32 %s252_s9, 4  ;;  %s16_s10 = int_to_ptr.vmem [resolvable:$true] %s15_s10 }
   0x2   :  { %s238_s11 = scalar_lea.vmem %s16_s10, 512  ;;  %p243_p1 = scmp.lt.s32.totalorder %s16_s10, %s16_s10 }
   0x3   :  { %p239_p0 = scmp.ne.s32.totalorder %s16_s10, %s238_s11  ;;  %p244_p2 = scmp.lt.s32.totalorder %s238_s11, %s238_s11 }
   0x5   :  { %p245_p3 = por %p244_p2, %p243_p1 }
   0x7   :  { %p246_p4 = pnand %p245_p3, %p239_p0 }
   0x9   :  { %249 = shalt.err (!%p246_p4)
}
   0xa   :  { %s253_s12 = smov 128   ;;  %s254_s13 = smov 8  }
   0xb   :  { %21 = dma.hbm_to_vmem [thread:$0]  %s282_s1, 512, %s16_s10, [#allocation3], %s253_s12, %s253_s12, %s254_s13  }
   0xc   :  { %250 = dma.done.wait [#allocation3], 512  }
   0xd   :  { %251 = vsyncadd [#allocation3], 4294966784  ;;  %v255_v0 = vmov 0.0   ;;  %vm256_vm0 = vmmov 0   ;;  %vm40_vm1 = vcmask 1043456   ;;  %vm36_vm2 = vcmask 31744  }
   0xe   :  { %211 = vmatprep.subr.mxu0 %v255_v0  ;;  %213 = vmatprep.mubr.msk.f32.mxu0 %vm256_vm0, %v255_v0  ;;  %v26_v1 = vld [vmem:[#allocation2] sm:$0xf]  ;;  %v31_v3 = vld [vmem:[#allocation2 + $0x18] sm:$0xff]  ;;  %v30_v4 = vld [vmem:[#allocation2 + $0x10] sm:$0xff]  ;;  %vm119_vm3 = vcmask 195584   ;;  %vm193_vm4 = vcmask 23552  }
   0xf   :  { %216 = vmatprep.subr.mxu1 %v255_v0  ;;  %222 = vmatprep.mubr.msk.f32.mxu1 %vm256_vm0, %v255_v0  ;;  %v25_v2 = vld [vmem:[%s281_s0] sm:$0xff]  ;;  %v29_v5 = vld [vmem:[#allocation2 + $0x8] sm:$0xff] }
  0x10   :  { %212 = vmatpush3.msk.msra.mxu0 %vm40_vm1, %v26_v1  ;;  %217 = vmatpush3.msra.mxu1 %v31_v3  ;;  %v200_v6 = vld [vmem:[#allocation2 + $0x4] ss:$0 sm:$0xff]  ;;  %v203_v11 = vld [vmem:[#allocation2 + $0x5] ss:$0 sm:$0xff] }
  0x11   :  { %214 = vmatmul.mubr.msk.f32.vlgmr.msra.gmra.mxu0 %vm36_vm2, %v25_v2  ;;  %218 = vmatprep.subr.mxu1 %v255_v0 }
  0x12   :  { %219 = vmatpush3.msra.mxu1 %v30_v4 }
  0x13   :  { %220 = vmatprep.subr.mxu1 %v255_v0 }
  0x14   :  { %221 = vmatpush3.msra.mxu1 %v29_v5 }
  0xd1   :  { %v110_v7 = vpop.f32.mrf.mxu0 }
  0xd2   :  { %v111_v8 = vadd.f32 %v200_v6, %v110_v7 }
  0xd3   :  { %v215_v9 = vpop.f32.mrf.mxu0 }
  0xd4   :  { %v114_v10 = vmax.f32 %v111_v8, 0.0 }
  0xd6   :  { %223 = vmatmul.mubr.msk.f32.vlgmr.msra.gmra.mxu1 %vm119_vm3, %v114_v10 }
 0x196   :  { %v189_v12 = vpop.f32.mrf.mxu1 }
 0x197   :  { %v190_v13 = vadd.f32 %v203_v11, %v189_v12 }
 0x198   :  { %v224_v14 = vpop.f32.mrf.mxu1 }
 0x199   :  { %194 = vst.msk [vmem:[%s283_s2] sm:$0xff] %vm193_vm4, %v190_v13 }
 0x19a   :  { %199 = vsyncpa [#allocation3], 1 }

</bundles_post_ra>
